<compile_context>
chip_gen: v6e
topology: v6e:2x2x1
jax: 0.10.0
libtpu: 0.0.40
codegen_flags: <defaults>
</compile_context>

<pallas_src>
import jax
import jax.numpy as jnp
from jax import lax
from jax.experimental import pallas as pl
from jax.experimental.pallas import tpu as pltpu


def _one_hot_kernel(types_ref, out_ref):
    # types_ref: (TN, 1) int32 ; out_ref: (TN, C) float
    tn, c = out_ref.shape
    cols = lax.broadcasted_iota(jnp.int32, (tn, c), 1)        # class index per column
    out_ref[...] = (cols == types_ref[...]).astype(out_ref.dtype)


def _round_up(x: int, m: int) -> int:
    return ((x + m - 1) // m) * m


def one_hot_atom_encoding(atom_types, positions, num_types: int = 50,
                          copy_features: bool = True, block_n: int = 4096):
    """Equivalent of OneHotAtomEncoding.forward.

    atom_types: int array [N] or [N, 1] (discrete atom type indices).
    positions:  float array [N, 3] — only its dtype is used (matches torch `.to(dtype=...)`).
    Returns (node_attrs, node_features); node_features is the same array when
    copy_features=True (JAX arrays are immutable so this matches the torch semantics of
    assigning one tensor to both dict keys), else None.

    Note: out-of-range / negative indices yield an all-zero row (jax.nn.one_hot behavior);
    torch.nn.functional.one_hot would raise instead.
    """
    out_dtype = positions.dtype
    types = jnp.asarray(atom_types)
    if types.ndim == 2:
        types = types[:, 0]                 # squeeze(-1)
    types = types.astype(jnp.int32)
    n = types.shape[0]

    SUB = 32   # sublane alignment covering f32(8)/bf16(16)/int8(32) output layouts

    if n <= block_n:
        # Single grid step; blocks equal the full array dims -> no padding, no slicing.
        bn = n
        n_pad = n
    else:
        bn = _round_up(min(block_n, n), SUB)
        # Exact shape when the tile divides N; otherwise pad rows and slice afterwards.
        n_pad = n if (n % bn == 0) else _round_up(n, bn)

    types_2d = types.reshape(n, 1)
    if n_pad != n:
        # Padded tail rows become class-0 one-hots and are sliced off below.
        types_2d = jnp.pad(types_2d, ((0, n_pad - n), (0, 0)))

    grid = (n_pad // bn,)
    out = pl.pallas_call(
        _one_hot_kernel,
        out_shape=jax.ShapeDtypeStruct((n_pad, num_types), out_dtype),
        grid_spec=pltpu.PrefetchScalarGridSpec(
            num_scalar_prefetch=0,
            grid=grid,
            in_specs=[pl.BlockSpec((bn, 1), lambda i: (i, 0))],
            out_specs=pl.BlockSpec((bn, num_types), lambda i: (i, 0)),
        ),
        compiler_params=pltpu.CompilerParams(
            dimension_semantics=("parallel",)),   # node axis is embarrassingly parallel
    )(types_2d)

    if n_pad != n:
        out = out[:n]
    if copy_features:
        return out, out
    return out, None


if __name__ == "__main__":
    key = jax.random.PRNGKey(0)
    k1, k2, k3, k4 = jax.random.split(key, 4)

    num_types = 50

    # --- small synthetic "graph": single full-array block, exact shape, no pad/slice ---
    n_atoms = 16
    atom_types = jax.random.randint(k1, (n_atoms, 1), 0, num_types, dtype=jnp.int32)
    positions = jax.random.normal(k2, (n_atoms, 3), dtype=jnp.float32)

    node_attrs, node_features = one_hot_atom_encoding(
        atom_types, positions, num_types=num_types, copy_features=True)
    node_attrs = jax.block_until_ready(node_attrs)
    node_features = jax.block_until_ready(node_features)

    ref = jax.nn.one_hot(atom_types[:, 0], num_types, dtype=positions.dtype)
    assert node_attrs.shape == (n_atoms, num_types)
    assert node_attrs.dtype == positions.dtype
    assert jnp.array_equal(node_attrs, ref)
    assert jnp.array_equal(node_features, ref)

    # --- multi-block, non-divisible N (pad + slice fallback path), bf16 output ---
    n2 = 100
    atom_types2 = jax.random.randint(k3, (n2,), 0, num_types, dtype=jnp.int32)
    positions2 = jnp.zeros((n2, 3), jnp.bfloat16)
    attrs2, feats2 = one_hot_atom_encoding(
        atom_types2, positions2, num_types=num_types, copy_features=True, block_n=32)
    attrs2 = jax.block_until_ready(attrs2)
    ref2 = jax.nn.one_hot(atom_types2, num_types, dtype=positions2.dtype)
    assert attrs2.shape == (n2, num_types)
    assert attrs2.dtype == jnp.bfloat16
    assert jnp.array_equal(attrs2, ref2)
    assert feats2 is attrs2  # single buffer, shared by reference (torch assigns same tensor)

    # --- multi-block, divisible N (exact-shape path, no pad/slice) ---
    n3 = 128
    atom_types3 = jax.random.randint(k4, (n3,), 0, num_types, dtype=jnp.int32)
    positions3 = jnp.ones((n3, 3), jnp.float32)
    attrs3, _ = one_hot_atom_encoding(
        atom_types3, positions3, num_types=num_types, copy_features=True, block_n=32)
    attrs3 = jax.block_until_ready(attrs3)
    ref3 = jax.nn.one_hot(atom_types3, num_types, dtype=jnp.float32)
    assert attrs3.shape == (n3, num_types)
    assert jnp.array_equal(attrs3, ref3)

    # --- copy_features=False path: no second output at all ---
    attrs4, feats4 = one_hot_atom_encoding(
        atom_types, positions, num_types=num_types, copy_features=False)
    attrs4 = jax.block_until_ready(attrs4)
    assert feats4 is None
    assert jnp.array_equal(attrs4, ref)

    print("KERNEL_OK")
</pallas_src>

<mosaic_0001>
module attributes {stable_mosaic.version = 11 : i64} {
  func.func @_one_hot_kernel(%arg0: i32, %arg1: memref<16x1xi32, #tpu.memory_space<vmem>>, %arg2: memref<16x50xf32, #tpu.memory_space<vmem>>) attributes {dimension_semantics = [#tpu.dimension_semantics<parallel>], iteration_bounds = array<i64: 1>, scalar_prefetch = 0 : i64, scratch_operands = 0 : i64, tpu.core_type = #tpu.core_type<tc>, window_params = [{transform_indices = @transform_0, window_bounds = array<i64: 16, 1>}, {transform_indices = @transform_1, window_bounds = array<i64: 16, 50>}]} {
    %0 = tpu.iota {dimensions = array<i32: 1>} : vector<16x50xi32>
    %c0 = arith.constant 0 : index
    %c0_0 = arith.constant 0 : index
    %1 = vector.load %arg1[%c0, %c0_0] : memref<16x1xi32, #tpu.memory_space<vmem>>, vector<16x1xi32>
    %2 = vector.broadcast %1 : vector<16x1xi32> to vector<16x50xi32>
    %3 = arith.cmpi eq, %0, %2 : vector<16x50xi32>
    %4 = arith.extui %3 : vector<16x50xi1> to vector<16x50xi32>
    %5 = arith.sitofp %4 : vector<16x50xi32> to vector<16x50xf32>
    %c0_1 = arith.constant 0 : index
    %c0_2 = arith.constant 0 : index
    %6 = vector.load %arg2[%c0_1, %c0_2] : memref<16x50xf32, #tpu.memory_space<vmem>>, vector<16x50xf32>
    tpu.vector_store %arg2[%c0_1, %c0_2], %5 {strides = array<i32>} : memref<16x50xf32, #tpu.memory_space<vmem>>, vector<16x50xf32>,
    return
  }
  func.func @transform_0(%arg0: i32) -> (i32, i32) {
    %c0_i32 = arith.constant 0 : i32
    %c0_i32_0 = arith.constant 0 : i32
    return %arg0, %c0_i32 : i32, i32
  }
  func.func @transform_1(%arg0: i32) -> (i32, i32) {
    %c0_i32 = arith.constant 0 : i32
    %c0_i32_0 = arith.constant 0 : i32
    return %arg0, %c0_i32 : i32, i32
  }
}

</mosaic_0001>

<bundles_post_ra>
// kernel: tpu_custom_call.1
= control target key start
LH: loop header
LB: loop body
LE: loop exit
PB: predicated region body
PF: predicated region fallthrough
CT: control target
= control target key end

     0   :  { %v74_v1 = vmov 0   ;;  %s98_s0 = inlined_call_operand.vmem [shape: s32[16,1], index: 0, kind: input, shape index: {}]   ;;  %s99_s1 = inlined_call_operand.hbm [shape: f32[16,50], index: 1, kind: output, shape index: {}]  }
   0x1   :  { %v11_v0 = vld [vmem:[%s98_s0] sm:$0xff]  ;;  %51 = vset.pattern.permute.xlu0 %v74_v1 }
   0x2   :  { %6 = vsyncpa [#allocation3], 0  ;;  %14 = vperm.xlu0 %51, %v11_v0   ;;  %v12_v2 = vld [vmem:[%s98_s0 + $0x8] sm:$0xff]  ;;  %v9_v3 = vlaneseq  ;;  %vm25_vm0 = vcmask 408576   ;;  %s75_s10 = smov [#allocation2]   ;;  %v76_v6 = vmov 0.0  }
   0x3   :  { %s33_s11 = sshll.u32 %s75_s10, 4  ;;  %s34_s11 = int_to_ptr.vmem [resolvable:$true] %s33_s11 }
   0x4   :  { %v10_v4 = vand.u32 127, %v9_v3  ;;  %s52_s12 = scalar_lea.vmem %s34_s11, 256  ;;  %p57_p1 = scmp.lt.s32.totalorder %s34_s11, %s34_s11 }
   0x5   :  { %p53_p0 = scmp.ne.s32.totalorder %s34_s11, %s52_s12  ;;  %p58_p2 = scmp.lt.s32.totalorder %s52_s12, %s52_s12 }
   0x6   :  { %17 = vperm.xlu0 %51, %v12_v2  }
   0x7   :  { %p59_p3 = por %p58_p2, %p57_p1 }
   0x9   :  { %p60_p4 = pnand %p59_p3, %p53_p0 }
  0x7d   :  { %v15_v5 = vpop.permute.xlu0 %14 }
  0x7e   :  { %vm19_vm1 = vcmp.eq.s32.totalorder %v10_v4, %v15_v5 }
  0x7f   :  { %v44_v7 = vsel %vm19_vm1, 1.0, %v76_v6 }
  0x80   :  { %26 = vst.msk [vmem:[#allocation2] sm:$0xff] %vm25_vm0, %v44_v7 }
  0x81   :  { %v18_v8 = vpop.permute.xlu0 %17 }
  0x82   :  { %vm20_vm2 = vcmp.eq.s32.totalorder %v10_v4, %v18_v8 }
  0x83   :  { %v45_v9 = vsel %vm20_vm2, 1.0, %v76_v6 }
  0x84   :  { %27 = vst.msk [vmem:[#allocation2 + $0x8] sm:$0xff] %vm25_vm0, %v45_v9 }
  0x85   :  { %63 = shalt.err (!%p60_p4)
}
  0x86   :  { %s77_s0 = smov 128   ;;  %s78_s13 = smov 8  }
  0x87   :  { %39 = dma.vmem_to_hbm [thread:$0]  %s34_s11, 256, %s99_s1, [#allocation3], %s77_s0, %s77_s0, %s78_s13  }
  0x88   :  { %72 = dma.done.wait [#allocation3], 256  }
  0x89   :  { %73 = vsyncadd [#allocation3], 4294967040 }
  0x8a   :  { %43 = vsyncpa [#allocation3], 1 }

</bundles_post_ra>
